<compile_context>
chip_gen: v5e
topology: v5e:2x2
jax: 0.10.0
libtpu: 0.0.40
codegen_flags: <defaults>
</compile_context>

<pallas_src>
import math

import jax
import jax.numpy as jnp
from jax import lax
from jax.experimental import pallas as pl
from jax.experimental.pallas import tpu as pltpu

H_LOGICAL = 20          # PyTorch hidden_sz default
HP = 32                 # padded hidden size -> 4*HP = 128 lanes (one vreg per gate slab)
LANES = 4 * HP          # 128
XS_WIDTH = 5 * HP       # [h0 | c0 | h1 | c1 | x,pad] = 160 lanes per row

# Weight-slab row layout (the two matmul weights start at multiples of 8 sublanes).
_R_WHH0 = 0             # rows [0, 32)  : W_hh of cell 1 (transposed, gate-padded)
_R_W1 = HP              # rows [32, 96) : stacked [W_ih ; W_hh] of cell 2
_R_WIH0 = 3 * HP        # row 96        : W_ih of cell 1 (input size 1)
_R_B0 = 3 * HP + 1      # row 97        : b_ih0 + b_hh0
_R_B1 = 3 * HP + 2      # row 98        : b_ih1 + b_hh1
_R_WOUT = 3 * HP + 3    # row 99        : Linear weight (cols 0:H)
_R_BOUT = 3 * HP + 4    # row 100       : Linear bias (broadcast across lanes)
_W_ROWS = 3 * HP + 8    # 104 rows total (padded to a multiple of 8)

_HIGHEST = lax.Precision.HIGHEST


# ----------------------------------------------------------------------------
# Kernel
# ----------------------------------------------------------------------------
def _sigmoid_eup(x):
    # sigmoid(x) == 0.5*tanh(0.5*x) + 0.5 : tanh runs on the EUP, keeping the VPU free.
    return 0.5 * jnp.tanh(0.5 * x) + 0.5


def _gate_block(gates, c_prev):
    # PyTorch LSTMCell gate order: i, f, g, o (each HP lanes wide, zero-padded).
    i = _sigmoid_eup(gates[:, 0 * HP:1 * HP])
    f = _sigmoid_eup(gates[:, 1 * HP:2 * HP])
    g = jnp.tanh(gates[:, 2 * HP:3 * HP])
    o = _sigmoid_eup(gates[:, 3 * HP:4 * HP])
    c_new = f * c_prev + i * g
    h_new = o * jnp.tanh(c_new)
    return h_new, c_new


def optimizer_fwd_kernel(xs_ref, w_ref, out_ref, lhs_ref):
    xs = xs_ref[...]                                   # (BB, 160)
    h0p = xs[:, 0 * HP:1 * HP]
    c0p = xs[:, 1 * HP:2 * HP]
    h1p = xs[:, 2 * HP:3 * HP]
    c1p = xs[:, 3 * HP:4 * HP]
    x = xs[:, 4 * HP:4 * HP + 1]                       # (BB, 1)

    w_hh0 = w_ref[_R_WHH0:_R_WHH0 + HP, :]             # (32, 128)
    w1 = w_ref[_R_W1:_R_W1 + 2 * HP, :]                # (64, 128)
    w_ih0 = w_ref[_R_WIH0:_R_WIH0 + 1, :]              # (1, 128)
    b0 = w_ref[_R_B0:_R_B0 + 1, :]                     # (1, 128)
    b1 = w_ref[_R_B1:_R_B1 + 1, :]                     # (1, 128)
    w_out = w_ref[_R_WOUT:_R_WOUT + 1, 0:HP]           # (1, 32)
    b_out = w_ref[_R_BOUT:_R_BOUT + 1, 0:HP]           # (1, 32)

    # --- LSTMCell 1 (input size 1): broadcast-mul for the K=1 term + ONE MXU dot.
    gates0 = (x * w_ih0
              + jnp.dot(h0p, w_hh0, precision=_HIGHEST,
                        preferred_element_type=jnp.float32)
              + b0)
    h0n, c0n = _gate_block(gates0, c0p)

    # --- LSTMCell 2: fuse its two matmuls into a single (BB,64)@(64,128) dot by
    #     assembling [h0_new | h1_prev] in VMEM scratch.
    lhs_ref[:, 0:HP] = h0n
    lhs_ref[:, HP:2 * HP] = h1p
    gates1 = (jnp.dot(lhs_ref[...], w1, precision=_HIGHEST,
                      preferred_element_type=jnp.float32)
              + b1)
    h1n, c1n = _gate_block(gates1, c1p)

    # --- Linear(H, 1): row-broadcast multiply + lane reduction (+ bias), broadcast
    #     over a 32-lane block so the output slab is fully written every row.
    y = jnp.sum(h1n * w_out, axis=-1, keepdims=True) + b_out   # (BB, 32)

    # One lane-dense (BB, 160) output block: [h0 | c0 | h1 | c1 | y].
    out_ref[:, 0 * HP:1 * HP] = h0n
    out_ref[:, 1 * HP:2 * HP] = c0n
    out_ref[:, 2 * HP:3 * HP] = h1n
    out_ref[:, 3 * HP:4 * HP] = c1n
    out_ref[:, 4 * HP:5 * HP] = y


# ----------------------------------------------------------------------------
# Wrapper
# ----------------------------------------------------------------------------
def _round_up(x, m):
    return (x + m - 1) // m * m


def _pad_lanes(a, width):
    return jnp.pad(a, ((0, 0), (0, width - a.shape[1])))


def optimizer_forward(inp, hidden, cell, params):
    """Pallas equivalent of Optimizer.forward(inp, hidden, cell).

    Returns (output (B,1), (hidden0, hidden1), (cell0, cell1))."""
    h0, h1 = hidden
    c0, c1 = cell
    B, H = h0.shape
    dt = inp.dtype
    wslab = params["wslab"]

    # Pack x + recurrent state into ONE lane-dense (B, 160) f32 slab.
    xs = jnp.concatenate(
        [_pad_lanes(h0, HP), _pad_lanes(c0, HP), _pad_lanes(h1, HP),
         _pad_lanes(c1, HP), _pad_lanes(inp, HP)], axis=1).astype(jnp.float32)

    bb = min(_round_up(B, 8), 1024)            # rows per grid step (~3 MiB live VMEM)
    b_pad = _round_up(B, bb)
    if b_pad != B:
        xs = jnp.pad(xs, ((0, b_pad - B), (0, 0)))
    grid = (b_pad // bb,)

    cost = pl.CostEstimate(
        flops=b_pad * (2 * HP * LANES + 2 * (2 * HP) * LANES + 24 * HP),
        transcendentals=b_pad * 10 * HP,
        bytes_accessed=2 * b_pad * XS_WIDTH * 4 + _W_ROWS * LANES * 4)

    out = pl.pallas_call(
        optimizer_fwd_kernel,
        out_shape=jax.ShapeDtypeStruct((b_pad, XS_WIDTH), jnp.float32),
        grid=grid,
        in_specs=[
            pl.BlockSpec((bb, XS_WIDTH), lambda i: (i, 0)),    # per-row data slab
            pl.BlockSpec((_W_ROWS, LANES), lambda i: (0, 0)),  # weights, resident
        ],
        out_specs=pl.BlockSpec((bb, XS_WIDTH), lambda i: (i, 0)),
        scratch_shapes=[pltpu.VMEM((bb, 2 * HP), jnp.float32)],
        input_output_aliases={0: 0},       # old state slab is dead: reuse its buffer
        compiler_params=pltpu.CompilerParams(
            dimension_semantics=("parallel",)),
        cost_estimate=cost,
    )(xs, wslab)

    out = out[:B].astype(dt)
    h0n = out[:, 0 * HP:0 * HP + H]
    c0n = out[:, 1 * HP:1 * HP + H]
    h1n = out[:, 2 * HP:2 * HP + H]
    c1n = out[:, 3 * HP:3 * HP + H]
    y = out[:, 4 * HP:4 * HP + 1]
    return y, (h0n, h1n), (c0n, c1n)


# ----------------------------------------------------------------------------
# Parameter init (PyTorch-style uniform(-1/sqrt(H), 1/sqrt(H))).
# Raw params are kept for the reference; the packed slab feeds the kernel.
# ----------------------------------------------------------------------------
def _pad_gates(w_t, rows_p, H):
    """(rows, 4H) gate-major matrix -> (rows_p, 4*HP), each gate block padded H->HP."""
    out = jnp.zeros((rows_p, 4 * HP), jnp.float32)
    r = w_t.shape[0]
    for g in range(4):
        out = out.at[:r, g * HP:g * HP + H].set(w_t[:, g * H:(g + 1) * H])
    return out


def init_params(key, hidden_sz=H_LOGICAL, dtype=jnp.float32):
    H = hidden_sz
    assert H <= HP
    bound = 1.0 / math.sqrt(H)
    ks = jax.random.split(key, 10)

    def u(k, shape):
        return jax.random.uniform(k, shape, dtype=dtype, minval=-bound, maxval=bound)

    # Raw PyTorch-layout parameters.
    w_ih0, w_hh0 = u(ks[0], (4 * H, 1)), u(ks[1], (4 * H, H))
    b_ih0, b_hh0 = u(ks[2], (4 * H,)), u(ks[3], (4 * H,))
    w_ih1, w_hh1 = u(ks[4], (4 * H, H)), u(ks[5], (4 * H, H))
    b_ih1, b_hh1 = u(ks[6], (4 * H,)), u(ks[7], (4 * H,))
    w_out, b_out = u(ks[8], (1, H)), u(ks[9], (1,))

    # Packed, pre-transposed, gate-padded weight slab (one DMA for all parameters).
    slab = jnp.zeros((_W_ROWS, LANES), jnp.float32)
    slab = slab.at[_R_WHH0:_R_WHH0 + HP, :].set(_pad_gates(w_hh0.T, HP, H))
    slab = slab.at[_R_W1:_R_W1 + HP, :].set(_pad_gates(w_ih1.T, HP, H))
    slab = slab.at[_R_W1 + HP:_R_W1 + 2 * HP, :].set(_pad_gates(w_hh1.T, HP, H))
    slab = slab.at[_R_WIH0, :].set(_pad_gates(w_ih0.T, 1, H)[0])
    slab = slab.at[_R_B0, :].set(_pad_gates((b_ih0 + b_hh0)[None, :], 1, H)[0])
    slab = slab.at[_R_B1, :].set(_pad_gates((b_ih1 + b_hh1)[None, :], 1, H)[0])
    slab = slab.at[_R_WOUT, :H].set(w_out[0])
    slab = slab.at[_R_BOUT, :].set(jnp.full((LANES,), b_out[0], jnp.float32))

    raw = dict(w_ih0=w_ih0, w_hh0=w_hh0, b_ih0=b_ih0, b_hh0=b_hh0,
               w_ih1=w_ih1, w_hh1=w_hh1, b_ih1=b_ih1, b_hh1=b_hh1,
               w_out=w_out, b_out=b_out)
    return {"wslab": slab, "raw": raw}


# ----------------------------------------------------------------------------
# Pure-JAX reference (exact PyTorch math on the raw weights) for the check
# ----------------------------------------------------------------------------
def reference_forward(inp, hidden, cell, params):
    r = params["raw"]
    H = hidden[0].shape[1]

    def lstm_cell(x, h, c, w_ih, w_hh, b_ih, b_hh):
        gates = (jnp.dot(x, w_ih.T, precision=_HIGHEST)
                 + jnp.dot(h, w_hh.T, precision=_HIGHEST)
                 + b_ih + b_hh)
        i = jax.nn.sigmoid(gates[:, 0 * H:1 * H])
        f = jax.nn.sigmoid(gates[:, 1 * H:2 * H])
        g = jnp.tanh(gates[:, 2 * H:3 * H])
        o = jax.nn.sigmoid(gates[:, 3 * H:4 * H])
        c_new = f * c + i * g
        return o * jnp.tanh(c_new), c_new

    h0, c0 = lstm_cell(inp, hidden[0], cell[0],
                       r["w_ih0"], r["w_hh0"], r["b_ih0"], r["b_hh0"])
    h1, c1 = lstm_cell(h0, hidden[1], cell[1],
                       r["w_ih1"], r["w_hh1"], r["b_ih1"], r["b_hh1"])
    y = jnp.dot(h1, r["w_out"].T, precision=_HIGHEST) + r["b_out"]
    return y, (h0, h1), (c0, c1)


if __name__ == "__main__":
    key = jax.random.PRNGKey(0)
    kp, ki, kh0, kh1, kc0, kc1 = jax.random.split(key, 6)

    B, H = 8, H_LOGICAL
    params = init_params(kp, H)
    inp = jax.random.normal(ki, (B, 1), dtype=jnp.float32)
    hidden = (jax.random.normal(kh0, (B, H), dtype=jnp.float32),
              jax.random.normal(kh1, (B, H), dtype=jnp.float32))
    cell = (jax.random.normal(kc0, (B, H), dtype=jnp.float32),
            jax.random.normal(kc1, (B, H), dtype=jnp.float32))

    fwd = jax.jit(optimizer_forward)
    out, (h0n, h1n), (c0n, c1n) = fwd(inp, hidden, cell, params)
    jax.block_until_ready((out, h0n, h1n, c0n, c1n))

    ref_out, (rh0, rh1), (rc0, rc1) = reference_forward(inp, hidden, cell, params)

    assert out.shape == (B, 1)
    for got, want in ((out, ref_out), (h0n, rh0), (h1n, rh1),
                      (c0n, rc0), (c1n, rc1)):
        assert got.shape == want.shape, (got.shape, want.shape)
        assert jnp.allclose(got, want, rtol=2e-5, atol=2e-5), (
            float(jnp.max(jnp.abs(got - want))))

    print("KERNEL_OK")
</pallas_src>

<mosaic_0001>
module attributes {stable_mosaic.version = 11 : i64} {
  func.func @optimizer_fwd_kernel(%arg0: i32, %arg1: memref<8x160xf32, #tpu.memory_space<vmem>>, %arg2: memref<104x128xf32, #tpu.memory_space<vmem>>, %arg3: memref<8x160xf32, #tpu.memory_space<vmem>>, %arg4: memref<8x64xf32, #tpu.memory_space<vmem>>) attributes {dimension_semantics = [#tpu.dimension_semantics<parallel>], iteration_bounds = array<i64: 1>, scalar_prefetch = 0 : i64, scratch_operands = 1 : i64, tpu.core_type = #tpu.core_type<tc>, window_params = [{transform_indices = @transform_0, window_bounds = array<i64: 8, 160>}, {pipeline_mode = #tpu.pipeline_mode<synchronous>, transform_indices = @transform_1, window_bounds = array<i64: 104, 128>}, {transform_indices = @transform_2, window_bounds = array<i64: 8, 160>}]} {
    %c0 = arith.constant 0 : index
    %c0_0 = arith.constant 0 : index
    %0 = vector.load %arg1[%c0, %c0_0] : memref<8x160xf32, #tpu.memory_space<vmem>>, vector<8x160xf32>
    %1 = vector.extract_strided_slice %0 {offsets = [0, 0], sizes = [8, 32], strides = [1, 1]} : vector<8x160xf32> to vector<8x32xf32>
    %2 = vector.extract_strided_slice %0 {offsets = [0, 32], sizes = [8, 32], strides = [1, 1]} : vector<8x160xf32> to vector<8x32xf32>
    %3 = vector.extract_strided_slice %0 {offsets = [0, 64], sizes = [8, 32], strides = [1, 1]} : vector<8x160xf32> to vector<8x32xf32>
    %4 = vector.extract_strided_slice %0 {offsets = [0, 96], sizes = [8, 32], strides = [1, 1]} : vector<8x160xf32> to vector<8x32xf32>
    %5 = vector.extract_strided_slice %0 {offsets = [0, 128], sizes = [8, 1], strides = [1, 1]} : vector<8x160xf32> to vector<8x1xf32>
    %c0_1 = arith.constant 0 : index
    %c0_2 = arith.constant 0 : index
    %6 = vector.load %arg2[%c0_1, %c0_2] : memref<104x128xf32, #tpu.memory_space<vmem>>, vector<32x128xf32>
    %c32 = arith.constant 32 : index
    %c0_3 = arith.constant 0 : index
    %7 = vector.load %arg2[%c32, %c0_3] : memref<104x128xf32, #tpu.memory_space<vmem>>, vector<64x128xf32>
    %c96 = arith.constant 96 : index
    %c0_4 = arith.constant 0 : index
    %8 = vector.load %arg2[%c96, %c0_4] : memref<104x128xf32, #tpu.memory_space<vmem>>, vector<1x128xf32>
    %c97 = arith.constant 97 : index
    %c0_5 = arith.constant 0 : index
    %9 = vector.load %arg2[%c97, %c0_5] : memref<104x128xf32, #tpu.memory_space<vmem>>, vector<1x128xf32>
    %c98 = arith.constant 98 : index
    %c0_6 = arith.constant 0 : index
    %10 = vector.load %arg2[%c98, %c0_6] : memref<104x128xf32, #tpu.memory_space<vmem>>, vector<1x128xf32>
    %c99 = arith.constant 99 : index
    %c0_7 = arith.constant 0 : index
    %11 = vector.load %arg2[%c99, %c0_7] : memref<104x128xf32, #tpu.memory_space<vmem>>, vector<1x32xf32>
    %c100 = arith.constant 100 : index
    %c0_8 = arith.constant 0 : index
    %12 = vector.load %arg2[%c100, %c0_8] : memref<104x128xf32, #tpu.memory_space<vmem>>, vector<1x32xf32>
    %13 = vector.broadcast %5 : vector<8x1xf32> to vector<8x128xf32>
    %14 = vector.broadcast %8 : vector<1x128xf32> to vector<8x128xf32>
    %15 = arith.mulf %13, %14 : vector<8x128xf32>
    %cst = arith.constant dense<0.000000e+00> : vector<8x128xf32>
    %16 = tpu.matmul %1, %6, %cst {dimension_numbers = #tpu.dot_dimension_numbers<[1], [0], [0], [1], [0, 0, 1, 1], [], []>, precision = #tpu.contract_precision<fp32>} : vector<8x32xf32>, vector<32x128xf32>, vector<8x128xf32> -> vector<8x128xf32>
    %17 = arith.addf %15, %16 : vector<8x128xf32>
    %18 = vector.broadcast %9 : vector<1x128xf32> to vector<8x128xf32>
    %19 = arith.addf %17, %18 : vector<8x128xf32>
    %20 = vector.extract_strided_slice %19 {offsets = [0, 0], sizes = [8, 32], strides = [1, 1]} : vector<8x128xf32> to vector<8x32xf32>
    %cst_9 = arith.constant 5.000000e-01 : f32
    %21 = vector.broadcast %cst_9 : f32 to vector<8x32xf32>
    %22 = arith.mulf %21, %20 : vector<8x32xf32>
    %23 = math.tanh %22 : vector<8x32xf32>
    %cst_10 = arith.constant 5.000000e-01 : f32
    %24 = vector.broadcast %cst_10 : f32 to vector<8x32xf32>
    %25 = arith.mulf %24, %23 : vector<8x32xf32>
    %cst_11 = arith.constant 5.000000e-01 : f32
    %26 = vector.broadcast %cst_11 : f32 to vector<8x32xf32>
    %27 = arith.addf %25, %26 : vector<8x32xf32>
    %28 = vector.extract_strided_slice %19 {offsets = [0, 32], sizes = [8, 32], strides = [1, 1]} : vector<8x128xf32> to vector<8x32xf32>
    %cst_12 = arith.constant 5.000000e-01 : f32
    %29 = vector.broadcast %cst_12 : f32 to vector<8x32xf32>
    %30 = arith.mulf %29, %28 : vector<8x32xf32>
    %31 = math.tanh %30 : vector<8x32xf32>
    %cst_13 = arith.constant 5.000000e-01 : f32
    %32 = vector.broadcast %cst_13 : f32 to vector<8x32xf32>
    %33 = arith.mulf %32, %31 : vector<8x32xf32>
    %cst_14 = arith.constant 5.000000e-01 : f32
    %34 = vector.broadcast %cst_14 : f32 to vector<8x32xf32>
    %35 = arith.addf %33, %34 : vector<8x32xf32>
    %36 = vector.extract_strided_slice %19 {offsets = [0, 64], sizes = [8, 32], strides = [1, 1]} : vector<8x128xf32> to vector<8x32xf32>
    %37 = math.tanh %36 : vector<8x32xf32>
    %38 = vector.extract_strided_slice %19 {offsets = [0, 96], sizes = [8, 32], strides = [1, 1]} : vector<8x128xf32> to vector<8x32xf32>
    %cst_15 = arith.constant 5.000000e-01 : f32
    %39 = vector.broadcast %cst_15 : f32 to vector<8x32xf32>
    %40 = arith.mulf %39, %38 : vector<8x32xf32>
    %41 = math.tanh %40 : vector<8x32xf32>
    %cst_16 = arith.constant 5.000000e-01 : f32
    %42 = vector.broadcast %cst_16 : f32 to vector<8x32xf32>
    %43 = arith.mulf %42, %41 : vector<8x32xf32>
    %cst_17 = arith.constant 5.000000e-01 : f32
    %44 = vector.broadcast %cst_17 : f32 to vector<8x32xf32>
    %45 = arith.addf %43, %44 : vector<8x32xf32>
    %46 = arith.mulf %35, %2 : vector<8x32xf32>
    %47 = arith.mulf %27, %37 : vector<8x32xf32>
    %48 = arith.addf %46, %47 : vector<8x32xf32>
    %49 = math.tanh %48 : vector<8x32xf32>
    %50 = arith.mulf %45, %49 : vector<8x32xf32>
    %c0_18 = arith.constant 0 : index
    %c0_19 = arith.constant 0 : index
    %51 = vector.load %arg4[%c0_18, %c0_19] : memref<8x64xf32, #tpu.memory_space<vmem>>, vector<8x32xf32>
    tpu.vector_store %arg4[%c0_18, %c0_19], %50 {strides = array<i32>} : memref<8x64xf32, #tpu.memory_space<vmem>>, vector<8x32xf32>,
    %c0_20 = arith.constant 0 : index
    %c32_21 = arith.constant 32 : index
    %52 = vector.load %arg4[%c0_20, %c32_21] : memref<8x64xf32, #tpu.memory_space<vmem>>, vector<8x32xf32>
    tpu.vector_store %arg4[%c0_20, %c32_21], %3 {strides = array<i32>} : memref<8x64xf32, #tpu.memory_space<vmem>>, vector<8x32xf32>,
    %c0_22 = arith.constant 0 : index
    %c0_23 = arith.constant 0 : index
    %53 = vector.load %arg4[%c0_22, %c0_23] : memref<8x64xf32, #tpu.memory_space<vmem>>, vector<8x64xf32>
    %cst_24 = arith.constant dense<0.000000e+00> : vector<8x128xf32>
    %54 = tpu.matmul %53, %7, %cst_24 {dimension_numbers = #tpu.dot_dimension_numbers<[1], [0], [0], [1], [0, 0, 1, 1], [], []>, precision = #tpu.contract_precision<fp32>} : vector<8x64xf32>, vector<64x128xf32>, vector<8x128xf32> -> vector<8x128xf32>
    %55 = vector.broadcast %10 : vector<1x128xf32> to vector<8x128xf32>
    %56 = arith.addf %54, %55 : vector<8x128xf32>
    %57 = vector.extract_strided_slice %56 {offsets = [0, 0], sizes = [8, 32], strides = [1, 1]} : vector<8x128xf32> to vector<8x32xf32>
    %cst_25 = arith.constant 5.000000e-01 : f32
    %58 = vector.broadcast %cst_25 : f32 to vector<8x32xf32>
    %59 = arith.mulf %58, %57 : vector<8x32xf32>
    %60 = math.tanh %59 : vector<8x32xf32>
    %cst_26 = arith.constant 5.000000e-01 : f32
    %61 = vector.broadcast %cst_26 : f32 to vector<8x32xf32>
    %62 = arith.mulf %61, %60 : vector<8x32xf32>
    %cst_27 = arith.constant 5.000000e-01 : f32
    %63 = vector.broadcast %cst_27 : f32 to vector<8x32xf32>
    %64 = arith.addf %62, %63 : vector<8x32xf32>
    %65 = vector.extract_strided_slice %56 {offsets = [0, 32], sizes = [8, 32], strides = [1, 1]} : vector<8x128xf32> to vector<8x32xf32>
    %cst_28 = arith.constant 5.000000e-01 : f32
    %66 = vector.broadcast %cst_28 : f32 to vector<8x32xf32>
    %67 = arith.mulf %66, %65 : vector<8x32xf32>
    %68 = math.tanh %67 : vector<8x32xf32>
    %cst_29 = arith.constant 5.000000e-01 : f32
    %69 = vector.broadcast %cst_29 : f32 to vector<8x32xf32>
    %70 = arith.mulf %69, %68 : vector<8x32xf32>
    %cst_30 = arith.constant 5.000000e-01 : f32
    %71 = vector.broadcast %cst_30 : f32 to vector<8x32xf32>
    %72 = arith.addf %70, %71 : vector<8x32xf32>
    %73 = vector.extract_strided_slice %56 {offsets = [0, 64], sizes = [8, 32], strides = [1, 1]} : vector<8x128xf32> to vector<8x32xf32>
    %74 = math.tanh %73 : vector<8x32xf32>
    %75 = vector.extract_strided_slice %56 {offsets = [0, 96], sizes = [8, 32], strides = [1, 1]} : vector<8x128xf32> to vector<8x32xf32>
    %cst_31 = arith.constant 5.000000e-01 : f32
    %76 = vector.broadcast %cst_31 : f32 to vector<8x32xf32>
    %77 = arith.mulf %76, %75 : vector<8x32xf32>
    %78 = math.tanh %77 : vector<8x32xf32>
    %cst_32 = arith.constant 5.000000e-01 : f32
    %79 = vector.broadcast %cst_32 : f32 to vector<8x32xf32>
    %80 = arith.mulf %79, %78 : vector<8x32xf32>
    %cst_33 = arith.constant 5.000000e-01 : f32
    %81 = vector.broadcast %cst_33 : f32 to vector<8x32xf32>
    %82 = arith.addf %80, %81 : vector<8x32xf32>
    %83 = arith.mulf %72, %4 : vector<8x32xf32>
    %84 = arith.mulf %64, %74 : vector<8x32xf32>
    %85 = arith.addf %83, %84 : vector<8x32xf32>
    %86 = math.tanh %85 : vector<8x32xf32>
    %87 = arith.mulf %82, %86 : vector<8x32xf32>
    %88 = vector.broadcast %11 : vector<1x32xf32> to vector<8x32xf32>
    %89 = arith.mulf %87, %88 : vector<8x32xf32>
    %cst_34 = arith.constant dense<0.000000e+00> : vector<8xf32>
    %90 = vector.multi_reduction <add>, %89, %cst_34 [1] : vector<8x32xf32> to vector<8xf32>
    %91 = vector.shape_cast %90 : vector<8xf32> to vector<8x1xf32>
    %92 = vector.broadcast %91 : vector<8x1xf32> to vector<8x32xf32>
    %93 = vector.broadcast %12 : vector<1x32xf32> to vector<8x32xf32>
    %94 = arith.addf %92, %93 : vector<8x32xf32>
    %c0_35 = arith.constant 0 : index
    %c0_36 = arith.constant 0 : index
    %95 = vector.load %arg3[%c0_35, %c0_36] : memref<8x160xf32, #tpu.memory_space<vmem>>, vector<8x32xf32>
    tpu.vector_store %arg3[%c0_35, %c0_36], %50 {strides = array<i32>} : memref<8x160xf32, #tpu.memory_space<vmem>>, vector<8x32xf32>,
    %c0_37 = arith.constant 0 : index
    %c32_38 = arith.constant 32 : index
    %96 = vector.load %arg3[%c0_37, %c32_38] : memref<8x160xf32, #tpu.memory_space<vmem>>, vector<8x32xf32>
    tpu.vector_store %arg3[%c0_37, %c32_38], %48 {strides = array<i32>} : memref<8x160xf32, #tpu.memory_space<vmem>>, vector<8x32xf32>,
    %c0_39 = arith.constant 0 : index
    %c64 = arith.constant 64 : index
    %97 = vector.load %arg3[%c0_39, %c64] : memref<8x160xf32, #tpu.memory_space<vmem>>, vector<8x32xf32>
    tpu.vector_store %arg3[%c0_39, %c64], %87 {strides = array<i32>} : memref<8x160xf32, #tpu.memory_space<vmem>>, vector<8x32xf32>,
    %c0_40 = arith.constant 0 : index
    %c96_41 = arith.constant 96 : index
    %98 = vector.load %arg3[%c0_40, %c96_41] : memref<8x160xf32, #tpu.memory_space<vmem>>, vector<8x32xf32>
    tpu.vector_store %arg3[%c0_40, %c96_41], %85 {strides = array<i32>} : memref<8x160xf32, #tpu.memory_space<vmem>>, vector<8x32xf32>,
    %c0_42 = arith.constant 0 : index
    %c128 = arith.constant 128 : index
    %99 = vector.load %arg3[%c0_42, %c128] : memref<8x160xf32, #tpu.memory_space<vmem>>, vector<8x32xf32>
    tpu.vector_store %arg3[%c0_42, %c128], %94 {strides = array<i32>} : memref<8x160xf32, #tpu.memory_space<vmem>>, vector<8x32xf32>,
    return
  }
  func.func @transform_0(%arg0: i32) -> (i32, i32) {
    %c0_i32 = arith.constant 0 : i32
    %c0_i32_0 = arith.constant 0 : i32
    return %arg0, %c0_i32 : i32, i32
  }
  func.func @transform_1(%arg0: i32) -> (i32, i32) {
    %c0_i32 = arith.constant 0 : i32
    %c0_i32_0 = arith.constant 0 : i32
    %c0_i32_1 = arith.constant 0 : i32
    return %c0_i32, %c0_i32_0 : i32, i32
  }
  func.func @transform_2(%arg0: i32) -> (i32, i32) {
    %c0_i32 = arith.constant 0 : i32
    %c0_i32_0 = arith.constant 0 : i32
    return %arg0, %c0_i32 : i32, i32
  }
}

</mosaic_0001>

<bundles_post_ra>
// kernel: optimizer_forward.1
= control target key start
LH: loop header
LB: loop body
LE: loop exit
PB: predicated region body
PF: predicated region fallthrough
CT: control target
= control target key end

     0   :  { %vm37_vm0 = vcmask 261120   ;;  %v585_v3 = vmov 0   ;;  %s586_s24 = smov 64   ;;  %s587_s25 = smov 32   ;;  %vm259_vm1 = vcmask 523520   ;;  %vm263_vm2 = vcmask 523264   ;;  %s746_s1 = inlined_call_operand.vmem [shape: f32[104,128], index: 1, kind: input, shape index: {}]   ;;  %s747_s0 = inlined_call_operand.vmem [shape: f32[8,160], index: 0, kind: input, shape index: {}, may-alias: {0,2}]   ;;  %s748_s2 = inlined_call_operand.vmem [shape: f32[8,160], index: 2, kind: output, shape index: {}, may-alias: {0,2}]  }
   0x1   :  { %v16_v0 = vld [vmem:[%s746_s1 + $0x18] sm:$0xff]  ;;  %v15_v1 = vld [vmem:[%s746_s1 + $0x10] sm:$0xff]  ;;  %v14_v2 = vld [vmem:[%s746_s1 + $0x8] sm:$0xff]  ;;  %567 = vset.pattern.permute.xlu0 %v585_v3  ;;  %s588_s30 = smov 96   ;;  %vm550_vm3 = vcmask 785920   ;;  %vm556_vm4 = vcmask 1048320  }
   0x2   :  { %v53_v4 = vand.u32 4294901760, %v16_v0  ;;  %v55_v5 = vand.u32 4294901760, %v15_v1  ;;  %v57_v6 = vand.u32 4294901760, %v14_v2  ;;  %v13_v7 = vld [vmem:[%s746_s1] sm:$0xff]  ;;  %v12_v9 = vld [vmem:[%s747_s0 + $0x8] sm:$0xff]  ;;  %v24_v61 = vld [vmem:[%s746_s1 + $0x58] sm:$0xff] }
   0x3   :  { %v619_v8 = vld [vmem:[%s747_s0] sm:$0xff]  ;;  %v59_v10 = vand.u32 4294901760, %v13_v7  ;;  %32 = vperm.xlu0 %567, %v12_v9   ;;  %v23_v62 = vld [vmem:[%s746_s1 + $0x50] sm:$0xff]  ;;  %v647_v63 = vand.u32 4294901760, %v24_v61 }
   0x4   :  { %v39_v11 = vsel %vm37_vm0, %v619_v8, 0  ;;  %v83_v12 = vsub.f32 %v16_v0, %v53_v4  ;;  %54 = vmatpush.msra.mxu0 %v53_v4  ;;  %v89_v13 = vsub.f32 %v15_v1, %v55_v5  ;;  %154 = vmatpush.msra.mxu3 %v53_v4  ;;  %v95_v14 = vsub.f32 %v14_v2, %v57_v6  ;;  %v568_v39 = vld [vmem:[%s746_s1 + $0x60] ss:$0 sm:$0xff]  ;;  %v569_v47 = vld [vmem:[%s746_s1 + $0x61] ss:$0 sm:$0xff] }
   0x5   :  { %v61_v15 = vand.u32 4294901760, %v39_v11  ;;  %v101_v16 = vsub.f32 %v13_v7, %v59_v10  ;;  %v649_v0 = vand.u32 4294901760, %v23_v62  ;;  %v652_v1 = vsub.f32 %v24_v61, %v647_v63 }
   0x6   :  { %125 = vmatpush.msra.mxu2 %v83_v12  ;;  %56 = vmatpush.msra.mxu0 %v55_v5  ;;  %v84_v17 = vand.u32 4294901760, %v83_v12  ;;  %v90_v18 = vand.u32 4294901760, %v89_v13  ;;  %v96_v20 = vand.u32 4294901760, %v95_v14 }
   0x7   :  { %v62_v19 = vsub.f32 %v39_v11, %v61_v15  ;;  %156 = vmatpush.msra.mxu3 %v55_v5  ;;  %v102_v21 = vand.u32 4294901760, %v101_v16  ;;  %v655_v2 = vsub.f32 %v23_v62, %v649_v0  ;;  %v310_v3 = vand.u32 4294901760, %v652_v1 }
   0x8   :  { %128 = vmatpush.msra.mxu2 %v89_v13  ;;  %v85_v22 = vsub.f32 %v83_v12, %v84_v17  ;;  %58 = vmatpush.msra.mxu0 %v57_v6  ;;  %v91_v23 = vsub.f32 %v89_v13, %v90_v18  ;;  %v97_v24 = vsub.f32 %v95_v14, %v96_v20  ;;  %v22_v12 = vld [vmem:[%s746_s1 + $0x48] sm:$0xff] }
   0x9   :  { %v63_v25 = vand.u32 4294901760, %v62_v19  ;;  %158 = vmatpush.msra.mxu3 %v57_v6  ;;  %v103_v29 = vsub.f32 %v101_v16, %v102_v21  ;;  %v677_v13 = vand.u32 4294901760, %v22_v12 }
   0xa   :  { %v86_v26 = vand.u32 4294901760, %v85_v22  ;;  %131 = vmatpush.msra.mxu2 %v95_v14  ;;  %v92_v27 = vand.u32 4294901760, %v91_v23  ;;  %60 = vmatpush.msra.mxu0 %v59_v10  ;;  %v98_v30 = vand.u32 4294901760, %v97_v24  ;;  %v21_v14 = vld [vmem:[%s746_s1 + $0x40] sm:$0xff] }
   0xb   :  { %v64_v28 = vsub.f32 %v62_v19, %v63_v25  ;;  %160 = vmatpush.msra.mxu3 %v59_v10  ;;  %v104_v32 = vand.u32 4294901760, %v103_v29 }
   0xc   :  { %183 = vmatpush.msrb.mxu0 %v84_v17  ;;  %87 = vmatpush.msra.mxu1 %v86_v26 }
   0xd   :  { %134 = vmatpush.msra.mxu2 %v101_v16  ;;  %v65_v31 = vand.u32 4294901760, %v64_v28  ;;  %164 = vmatmul.f32.vlgmr.msra.gmra.mxu3 %v63_v25  ;;  %v683_v16 = vand.u32 4294901760, %v21_v14  ;;  %v18_v25 = vld [vmem:[%s746_s1 + $0x28] sm:$0xff] }
   0xe   :  { %137 = vmatmul.f32.vlgmr.msra.gmra.mxu2 %v62_v19  ;;  %93 = vmatpush.msra.mxu1 %v92_v27 }
   0xf   :  { %66 = vmatmul.f32.vlgmr.msra.gmra.mxu0 %v65_v31  ;;  %276 = vmatpush.msrb.mxu2 %v647_v63  ;;  %v17_v31 = vld [vmem:[%s746_s1 + $0x20] sm:$0xff] }
  0x10   :  { %187 = vmatpush.msrb.mxu0 %v90_v18  ;;  %99 = vmatpush.msra.mxu1 %v98_v30  ;;  %v327_v18 = vsub.f32 %v21_v14, %v683_v16  ;;  %v287_v30 = vand.u32 4294901760, %v18_v25 }
  0x11   :  { %278 = vmatpush.msrb.mxu2 %v649_v0 }
  0x12   :  { %191 = vmatpush.msrb.mxu0 %v96_v20  ;;  %105 = vmatpush.msra.mxu1 %v104_v32  ;;  %v19_v20 = vld [vmem:[%s746_s1 + $0x30] sm:$0xff]  ;;  %v328_v22 = vand.u32 4294901760, %v327_v18 }
  0x13   :  { %107 = vmatmul.f32.vlgmr.msra.gmra.mxu1 %v61_v15  ;;  %280 = vmatpush.msrb.mxu2 %v677_v13  ;;  %v285_v24 = vand.u32 4294901760, %v19_v20 }
  0x14   :  { %195 = vmatpush.msrb.mxu0 %v102_v21  ;;  %214 = vmatpush.msrb.mxu1 %v53_v4  ;;  %v316_v4 = vand.u32 4294901760, %v655_v2  ;;  %v329_v27 = vsub.f32 %v327_v18, %v328_v22 }
  0x15   :  { %282 = vmatpush.msrb.mxu2 %v683_v16  ;;  %v339_v29 = vsub.f32 %v19_v20, %v285_v24 }
  0x16   :  { %216 = vmatpush.msrb.mxu1 %v55_v5  ;;  %371 = vmatpush.msra.mxu0 %v652_v1  ;;  %v311_v5 = vsub.f32 %v652_v1, %v310_v3  ;;  %v330_v32 = vand.u32 4294901760, %v329_v27 }
  0x17   :  { %197 = vmatmul.f32.vlgmr.msrb.gmra.mxu0 %v61_v15 }
  0x18   :  { %218 = vmatpush.msrb.mxu1 %v57_v6  ;;  %v317_v6 = vsub.f32 %v655_v2, %v316_v4  ;;  %374 = vmatpush.msra.mxu0 %v655_v2  ;;  %v312_v7 = vand.u32 4294901760, %v311_v5 }
  0x1a   :  { %220 = vmatpush.msrb.mxu1 %v59_v10  ;;  %v318_v9 = vand.u32 4294901760, %v317_v6  ;;  %313 = vmatpush.msrb.mxu3 %v312_v7 }
  0x1b   :  { %222 = vmatmul.f32.vlgmr.msrb.gmra.mxu1 %v61_v15  ;;  %v321_v15 = vsub.f32 %v22_v12, %v677_v13 }
  0x1c   :  { %408 = vmatpush.msra.mxu1 %v647_v63  ;;  %319 = vmatpush.msrb.mxu3 %v318_v9 }
  0x1d   :  { %v322_v17 = vand.u32 4294901760, %v321_v15  ;;  %377 = vmatpush.msra.mxu0 %v321_v15 }
  0x1e   :  { %410 = vmatpush.msra.mxu1 %v649_v0 }
  0x1f   :  { %v323_v21 = vsub.f32 %v321_v15, %v322_v17  ;;  %380 = vmatpush.msra.mxu0 %v327_v18 }
  0x20   :  { %412 = vmatpush.msra.mxu1 %v677_v13 }
  0x21   :  { %v324_v26 = vand.u32 4294901760, %v323_v21 }
  0x22   :  { %414 = vmatpush.msra.mxu1 %v683_v16 }
  0x23   :  { %325 = vmatpush.msrb.mxu3 %v324_v26  ;;  %v572_v26 = vld [vmem:[%s746_s1 + $0x64] ss:$0 sm:$0xff] }
  0x25   :  { %331 = vmatpush.msrb.mxu3 %v330_v32 }
  0x75   :  { %v33_v41 = vpop.permute.xlu0 %32 }
  0x76   :  { %v36_v44 = vmul.f32 %v568_v39, %v33_v41 }
  0x8c   :  { %v67_v33 = vpop.f32.mrf.mxu0 }
  0x90   :  { %v108_v34 = vpop.f32.mrf.mxu1  ;;  %v165_v37 = vpop.f32.mrf.mxu3 }
  0x91   :  { %v138_v35 = vpop.f32.mrf.mxu2  ;;  %v109_v36 = vadd.f32 %v108_v34, %v67_v33  ;;  %v340_v34 = vand.u32 4294901760, %v339_v29 }
  0x93   :  { %v139_v38 = vadd.f32 %v138_v35, %v109_v36  ;;  %v289_v35 = vand.u32 4294901760, %v17_v31  ;;  %v345_v36 = vsub.f32 %v18_v25, %v287_v30 }
  0x94   :  { %v198_v40 = vpop.f32.mrf.mxu0 }
  0x95   :  { %v166_v42 = vadd.f32 %v165_v37, %v139_v38  ;;  %v341_v38 = vsub.f32 %v339_v29, %v340_v34  ;;  %v351_v39 = vsub.f32 %v17_v31, %v289_v35 }
  0x97   :  { %v199_v43 = vadd.f32 %v198_v40, %v166_v42  ;;  %v346_v40 = vand.u32 4294901760, %v345_v36  ;;  %v342_v41 = vand.u32 4294901760, %v341_v38  ;;  %v352_v42 = vand.u32 4294901760, %v351_v39 }
  0x98   :  { %v223_v45 = vpop.f32.mrf.mxu1 }
  0x99   :  { %v224_v46 = vadd.f32 %v223_v45, %v199_v43  ;;  %v347_v43 = vsub.f32 %v345_v36, %v346_v40 }
  0x9b   :  { %v226_v48 = vadd.f32 %v224_v46, %v36_v44  ;;  %v353_v44 = vsub.f32 %v351_v39, %v352_v42  ;;  %v348_v45 = vand.u32 4294901760, %v347_v43 }
  0x9d   :  { %v228_v49 = vadd.f32 %v569_v47, %v226_v48  ;;  %v354_v46 = vand.u32 4294901760, %v353_v44 }
  0x9f   :  { %573 = vtanh.f32 %v228_v49  ;;  %v229_v51 = vmul.f32 0.5, %v228_v49 }
  0xa1   :  { %575 = vtanh.f32 %v229_v51 }
  0xa5   :  { %v574_v50 = vpop.eup %573 }
  0xa6   :  { %236 = vrot.lane.b32.xlu0 %v574_v50, %s586_s24 }
  0xa7   :  { %v576_v52 = vpop.eup %575 }
  0xa8   :  { %v231_v53 = vmul.f32 0.5, %v576_v52 }
  0xaa   :  { %v232_v54 = vadd.f32 0.5, %v231_v53 }
  0xac   :  { %v234_v57 = vmul.f32 %v232_v54, %v619_v8 }
 0x118   :  { %v237_v55 = vpop.permute.xlu0 %236 }
 0x119   :  { %v239_v56 = vmul.f32 %v237_v55, %v232_v54 }
 0x11b   :  { %241 = vrot.lane.b32.xlu1 %v239_v56, %s587_s25  ;;  %v570_v56 = vld [vmem:[%s746_s1 + $0x62] ss:$0 sm:$0xff] }
 0x18d   :  { %v242_v58 = vpop.permute.xlu1 %241 }
 0x18e   :  { %v635_v59 = vadd.f32 %v242_v58, %v234_v57 }
 0x190   :  { %577 = vtanh.f32 %v635_v59 }
 0x196   :  { %v578_v60 = vpop.eup %577 }
 0x197   :  { %247 = vrot.lane.b32.xlu1 %v578_v60, %s586_s24 }
 0x19f   :  { %509 = vrot.lane.b32.xlu1 %v619_v8, %s586_s24 }
 0x209   :  { %v248_v10 = vpop.permute.xlu1 %247 }
 0x20a   :  { %v250_v11 = vmul.f32 %v248_v10, %v232_v54 }
 0x20c   :  { %252 = vrot.lane.b32.xlu2 %v250_v11, %s587_s25 }
 0x211   :  { %v510_v14 = vpop.permute.xlu1 %509 }
 0x214   :  { %256 = vrot.lane.b32.xlu2 %v619_v8, %s588_s30  ;;  %v20_v8 = vld [vmem:[%s746_s1 + $0x38] sm:$0xff] }
 0x215   :  { %v283_v19 = vand.u32 4294901760, %v20_v8 }
 0x217   :  { %v333_v23 = vsub.f32 %v20_v8, %v283_v19  ;;  %284 = vmatpush.msrb.mxu2 %v283_v19  ;;  %416 = vmatpush.msra.mxu1 %v283_v19 }
 0x219   :  { %v334_v28 = vand.u32 4294901760, %v333_v23  ;;  %383 = vmatpush.msra.mxu0 %v333_v23  ;;  %286 = vmatpush.msrb.mxu2 %v285_v24 }
 0x21a   :  { %418 = vmatpush.msra.mxu1 %v285_v24 }
 0x21b   :  { %v335_v33 = vsub.f32 %v333_v23, %v334_v28  ;;  %386 = vmatpush.msra.mxu0 %v339_v29  ;;  %288 = vmatpush.msrb.mxu2 %v287_v30 }
 0x21c   :  { %420 = vmatpush.msra.mxu1 %v287_v30 }
 0x21d   :  { %v336_v37 = vand.u32 4294901760, %v335_v33  ;;  %389 = vmatpush.msra.mxu0 %v345_v36  ;;  %290 = vmatpush.msrb.mxu2 %v289_v35 }
 0x21e   :  { %422 = vmatpush.msra.mxu1 %v289_v35 }
 0x21f   :  { %337 = vmatpush.msrb.mxu3 %v336_v37  ;;  %441 = vmatpush.msra.mxu2 %v310_v3 }
 0x220   :  { %392 = vmatpush.msra.mxu0 %v351_v39 }
 0x221   :  { %343 = vmatpush.msrb.mxu3 %v342_v41  ;;  %445 = vmatpush.msra.mxu2 %v316_v4 }
 0x223   :  { %449 = vmatpush.msra.mxu2 %v322_v17  ;;  %349 = vmatpush.msrb.mxu3 %v348_v45 }
 0x225   :  { %453 = vmatpush.msra.mxu2 %v328_v22  ;;  %355 = vmatpush.msrb.mxu3 %v354_v46 }
 0x227   :  { %484 = vmatpush.msra.mxu3 %v647_v63  ;;  %457 = vmatpush.msra.mxu2 %v334_v28 }
 0x229   :  { %486 = vmatpush.msra.mxu3 %v649_v0  ;;  %461 = vmatpush.msra.mxu2 %v340_v34 }
 0x22b   :  { %488 = vmatpush.msra.mxu3 %v677_v13  ;;  %465 = vmatpush.msra.mxu2 %v346_v40  ;;  %v571_v13 = vld [vmem:[%s746_s1 + $0x63] ss:$0 sm:$0xff] }
 0x22c   :  { %531 = vrot.lane.b32.xlu1 %v571_v13, %s588_s30 }
 0x22d   :  { %490 = vmatpush.msra.mxu3 %v683_v16  ;;  %469 = vmatpush.msra.mxu2 %v352_v42 }
 0x22f   :  { %492 = vmatpush.msra.mxu3 %v283_v19 }
 0x231   :  { %494 = vmatpush.msra.mxu3 %v285_v24 }
 0x233   :  { %496 = vmatpush.msra.mxu3 %v287_v30 }
 0x235   :  { %498 = vmatpush.msra.mxu3 %v289_v35 }
 0x266   :  { %v253_v47 = vpop.permute.xlu2 %252 }
 0x267   :  { %255 = vst.msk [vmem:[#allocation2] sm:$0xff] %vm37_vm0, %v253_v47 }
 0x268   :  { %544 = vst.msk [vmem:[%s748_s2] sm:$0xff] %vm37_vm0, %v253_v47 }
 0x269   :  { %545 = vst.msk [vmem:[%s748_s2] sm:$0xff] %vm259_vm1, %v635_v59 }
 0x26e   :  { %v257_v48 = vpop.permute.xlu2 %256 }
 0x26f   :  { %260 = vst.msk [vmem:[#allocation2] sm:$0xff] %vm259_vm1, %v257_v48 }
 0x276   :  { %v261_v49 = vld [vmem:[#allocation2] sm:$0xff] }
 0x277   :  { %v265_v50 = vsel %vm263_vm2, %v261_v49, 0 }
 0x278   :  { %v291_v51 = vand.u32 4294901760, %v265_v50 }
 0x27a   :  { %357 = vmatmul.f32.vlgmr.msrb.gmra.mxu3 %v291_v51  ;;  %v292_v52 = vsub.f32 %v265_v50, %v291_v51 }
 0x27c   :  { %395 = vmatmul.f32.vlgmr.msra.gmra.mxu0 %v292_v52  ;;  %v293_v53 = vand.u32 4294901760, %v292_v52 }
 0x27e   :  { %426 = vmatmul.f32.vlgmr.msra.gmra.mxu1 %v293_v53  ;;  %v294_v54 = vsub.f32 %v292_v52, %v293_v53 }
 0x280   :  { %v295_v55 = vand.u32 4294901760, %v294_v54 }
 0x282   :  { %296 = vmatmul.f32.vlgmr.msrb.gmra.mxu2 %v295_v55  ;;  %500 = vmatmul.f32.vlgmr.msra.gmra.mxu3 %v291_v51 }
 0x28a   :  { %471 = vmatmul.f32.vlgmr.msra.gmra.mxu2 %v291_v51 }
 0x29e   :  { %v532_v19 = vpop.permute.xlu1 %531 }
 0x2f9   :  { %v396_v61 = vpop.f32.mrf.mxu0 }
 0x2fb   :  { %v427_v63 = vpop.f32.mrf.mxu1 }
 0x2fd   :  { %v358_v57 = vpop.f32.mrf.mxu3 }
 0x305   :  { %v297_v58 = vpop.f32.mrf.mxu2  ;;  %v501_v3 = vpop.f32.mrf.mxu3 }
 0x306   :  { %v298_v59 = vadd.f32 %v570_v56, %v297_v58 }
 0x308   :  { %v359_v60 = vadd.f32 %v358_v57, %v298_v59 }
 0x30a   :  { %v397_v62 = vadd.f32 %v396_v61, %v359_v60 }
 0x30c   :  { %v428_v0 = vadd.f32 %v427_v63, %v397_v62 }
 0x30d   :  { %v472_v1 = vpop.f32.mrf.mxu2 }
 0x30e   :  { %v473_v2 = vadd.f32 %v472_v1, %v428_v0 }
 0x310   :  { %v502_v4 = vadd.f32 %v501_v3, %v473_v2 }
 0x312   :  { %579 = vtanh.f32 %v502_v4  ;;  %v504_v6 = vmul.f32 0.5, %v502_v4 }
 0x314   :  { %581 = vtanh.f32 %v504_v6 }
 0x318   :  { %v580_v5 = vpop.eup %579 }
 0x319   :  { %514 = vrot.lane.b32.xlu0 %v580_v5, %s586_s24 }
 0x31a   :  { %v582_v7 = vpop.eup %581 }
 0x31b   :  { %v506_v9 = vmul.f32 0.5, %v582_v7 }
 0x31d   :  { %v507_v10 = vadd.f32 0.5, %v506_v9 }
 0x31f   :  { %v512_v15 = vmul.f32 %v510_v14, %v507_v10 }
 0x38b   :  { %v515_v11 = vpop.permute.xlu0 %514 }
 0x38c   :  { %v517_v12 = vmul.f32 %v515_v11, %v507_v10 }
 0x38e   :  { %519 = vrot.lane.b32.xlu2 %v517_v12, %s587_s25 }
 0x3e8   :  { %v520_v16 = vpop.permute.xlu2 %519 }
 0x3e9   :  { %v522_v8 = vadd.f32 %v520_v16, %v512_v15 }
 0x3eb   :  { %583 = vtanh.f32 %v522_v8 }
 0x3f1   :  { %v584_v17 = vpop.eup %583 }
 0x3f2   :  { %525 = vrot.lane.b32.xlu0 %v584_v17, %s586_s24 }
 0x464   :  { %v526_v18 = vpop.permute.xlu0 %525 }
 0x465   :  { %v528_v20 = vmul.f32 %v526_v18, %v507_v10 }
 0x467   :  { %v534_v21 = vmul.f32 %v532_v19, %v528_v20  ;;  %547 = vrot.lane.b32.xlu1 %v528_v20, %s588_s30 }
 0x469   :  { %536 = vrot.lane.b32.xlu2 %v534_v21, %s587_s25 }
 0x471   :  { %553 = vrot.lane.b32.xlu2 %v522_v8, %s586_s24 }
 0x4c3   :  { %v537_v22 = vpop.permute.xlu2 %536 }
 0x4c4   :  { %v539_v23 = vsel %vm37_vm0, %v537_v22, 0.0 }
 0x4c5   :  { %540 = vadd.xlane.f32.xlu0 %v539_v23 }
 0x4cb   :  { %v554_v25 = vpop.permute.xlu2 %553 }
 0x4d9   :  { %v548_v24 = vpop.permute.xlu1 %547 }
 0x4da   :  { %551 = vst.msk [vmem:[%s748_s2] sm:$0xff] %vm550_vm3, %v548_v24 }
 0x4db   :  { %557 = vst.msk [vmem:[%s748_s2] sm:$0xff] %vm556_vm4, %v554_v25 }
 0x538   :  { %v541_v27 = vpop.xlane.xlu0 %540 }
 0x539   :  { %v543_v28 = vadd.f32 %v572_v26, %v541_v27 }
 0x53b   :  { %558 = vst.msk [vmem:[%s748_s2 + $0x8] sm:$0xff] %vm37_vm0, %v543_v28 }

</bundles_post_ra>
